<compile_context>
chip_gen: v7x
topology: tpu7x:2x2x1
jax: 0.10.0
libtpu: 0.0.40
codegen_flags: <defaults>
</compile_context>

<pallas_src>
import jax
import jax.numpy as jnp
from jax.experimental import pallas as pl
from jax.experimental.pallas import tpu as pltpu

_EPS = 1e-5
_K = 3  # ksize=3, padding='same'


# ----------------------------- in-kernel helpers --------------------------------
def _conv3_same(h, w_ref):
    """h: (Cin, L) f32, w_ref: (3, Cout, Cin). 'same' cross-correlation.

    conv(x)[:, l] = W0 @ x[:, l-1] + W1 @ x[:, l] + W2 @ x[:, l+1]  (zero pad).
    The channel matmul acts per-position, so we matmul the unshifted activation
    once per tap and roll/mask the (Cout, L) products along the lane axis.
    """
    L = h.shape[-1]
    y0 = jnp.dot(w_ref[0], h, preferred_element_type=jnp.float32)
    y1 = jnp.dot(w_ref[1], h, preferred_element_type=jnp.float32)
    y2 = jnp.dot(w_ref[2], h, preferred_element_type=jnp.float32)
    lane = jax.lax.broadcasted_iota(jnp.int32, y1.shape, dimension=1)
    left = jnp.where(lane > 0, pltpu.roll(y0, shift=1, axis=1), 0.0)           # x[l-1] tap
    right = jnp.where(lane < L - 1, pltpu.roll(y2, shift=L - 1, axis=1), 0.0)  # x[l+1] tap
    return left + y1 + right


def _emit_stats(y, s_ref, q_ref):
    # One-pass per-channel partial sums for BatchNorm (reduced over L here,
    # over the batch grid axis in the wrapper).
    s_ref[0] = jnp.sum(y, axis=1, keepdims=True)
    q_ref[0] = jnp.sum(y * y, axis=1, keepdims=True)


# --------------------------------- kernels ---------------------------------------
def _conv_stats_kernel(x_ref, w_ref, y_ref, s_ref, q_ref):
    y = _conv3_same(x_ref[0].astype(jnp.float32), w_ref)
    y_ref[0] = y
    _emit_stats(y, s_ref, q_ref)


def _bn_act_conv_stats_kernel(h_ref, scale_ref, shift_ref, w_ref, y_ref, s_ref, q_ref):
    h = h_ref[0].astype(jnp.float32)
    a = jnp.maximum(h * scale_ref[...] + shift_ref[...], 0.0)  # BN + ReLU (dropout=0 -> identity)
    y = _conv3_same(a, w_ref)
    y_ref[0] = y
    _emit_stats(y, s_ref, q_ref)


def _bn_residual_act_kernel(h_ref, scale_ref, shift_ref, x_ref, o_ref):
    h = h_ref[0].astype(jnp.float32)
    y = h * scale_ref[...] + shift_ref[...] + x_ref[0].astype(jnp.float32)
    o_ref[0] = jnp.maximum(y, 0.0).astype(o_ref.dtype)


# --------------------------------- wrapper ----------------------------------------
def _affine_from_stats(psum, psumsq, gamma, beta, count):
    """Per-batch partial stats -> BN scale/shift (training mode, biased variance)."""
    s = jnp.sum(psum, axis=0)[:, 0]      # (C,)
    q = jnp.sum(psumsq, axis=0)[:, 0]    # (C,)
    mean = s / count
    var = jnp.maximum(q / count - mean * mean, 0.0)
    scale = gamma.astype(jnp.float32) * jax.lax.rsqrt(var + _EPS)
    shift = beta.astype(jnp.float32) - mean * scale
    return scale.reshape(-1, 1), shift.reshape(-1, 1)


@jax.jit
def resnet_block_forward(x_ncl, w1, w2, w3, g1, b1, g2, b2, g3, b3):
    """x_ncl: (N, C, L) like PyTorch.  w*: (Cout, Cin, K) like PyTorch Conv1d."""
    x = x_ncl.astype(jnp.float32)
    N, C, L = x.shape
    count = N * L
    # (Cout, Cin, K) -> (K, Cout, Cin): w_ref[k] is the per-tap channel-mixing matrix.
    tw = lambda w: jnp.transpose(w, (2, 0, 1)).astype(jnp.float32)

    params = pltpu.CompilerParams(dimension_semantics=("parallel",))
    row_spec = pl.BlockSpec((1, C, L), lambda n: (n, 0, 0))   # one batch row per grid step
    w_spec = pl.BlockSpec((_K, C, C), lambda n: (0, 0, 0))    # resident across the grid
    cvec_spec = pl.BlockSpec((C, 1), lambda n: (0, 0))
    stat_spec = pl.BlockSpec((1, C, 1), lambda n: (n, 0, 0))

    act_shape = jax.ShapeDtypeStruct((N, C, L), jnp.float32)
    stat_shape = jax.ShapeDtypeStruct((N, C, 1), jnp.float32)

    conv_stats = pl.pallas_call(
        _conv_stats_kernel,
        grid=(N,),
        in_specs=[row_spec, w_spec],
        out_specs=(row_spec, stat_spec, stat_spec),
        out_shape=(act_shape, stat_shape, stat_shape),
        compiler_params=params,
    )
    bn_act_conv_stats = pl.pallas_call(
        _bn_act_conv_stats_kernel,
        grid=(N,),
        in_specs=[row_spec, cvec_spec, cvec_spec, w_spec],
        out_specs=(row_spec, stat_spec, stat_spec),
        out_shape=(act_shape, stat_shape, stat_shape),
        compiler_params=params,
    )
    bn_residual_act = pl.pallas_call(
        _bn_residual_act_kernel,
        grid=(N,),
        in_specs=[row_spec, cvec_spec, cvec_spec, row_spec],
        out_specs=row_spec,
        out_shape=act_shape,
        compiler_params=params,
        # input_output_aliases={3: 0} would reuse x's HBM buffer when the caller
        # donates x; omitted here because this script reuses x afterwards.
    )

    # Pass 1: conv1 + per-batch partial BN stats.
    h1, s1, q1 = conv_stats(x, tw(w1))
    sc1, sh1 = _affine_from_stats(s1, q1, g1, b1, count)
    # Pass 2: BN1 + ReLU + conv2 (+ stats).
    h2, s2, q2 = bn_act_conv_stats(h1, sc1, sh1, tw(w2))
    sc2, sh2 = _affine_from_stats(s2, q2, g2, b2, count)
    # Pass 3: BN2 + ReLU + conv3 (+ stats).
    h3, s3, q3 = bn_act_conv_stats(h2, sc2, sh2, tw(w3))
    sc3, sh3 = _affine_from_stats(s3, q3, g3, b3, count)
    # Pass 4: BN3 + residual + ReLU.
    return bn_residual_act(h3, sc3, sh3, x)


# ---------------------------- pure-JAX reference -----------------------------------
def _reference(x, w1, w2, w3, g1, b1, g2, b2, g3, b3):
    x = x.astype(jnp.float32)

    def conv(h, w):
        return jax.lax.conv_general_dilated(
            h, w.astype(jnp.float32), window_strides=(1,), padding="SAME",
            dimension_numbers=("NCH", "OIH", "NCH"))

    def bn(h, g, b):
        mean = jnp.mean(h, axis=(0, 2), keepdims=True)
        var = jnp.mean(jnp.square(h - mean), axis=(0, 2), keepdims=True)
        return (h - mean) * jax.lax.rsqrt(var + _EPS) * g.reshape(1, -1, 1) + b.reshape(1, -1, 1)

    relu = lambda t: jnp.maximum(t, 0.0)
    h = relu(bn(conv(x, w1), g1, b1))
    h = relu(bn(conv(h, w2), g2, b2))
    h = bn(conv(h, w3), g3, b3) + x
    return relu(h)


if __name__ == "__main__":
    N, C, L, K = 2, 4, 128, 3  # L multiple of 128 -> lane-dense stores
    key = jax.random.PRNGKey(0)
    kx, k1, k2, k3 = jax.random.split(key, 4)

    x = jax.random.normal(kx, (N, C, L), dtype=jnp.float32)
    scale = (C * K) ** -0.5  # deterministic synthetic init (Conv1d-like scale)
    w1 = jax.random.normal(k1, (C, C, K), dtype=jnp.float32) * scale
    w2 = jax.random.normal(k2, (C, C, K), dtype=jnp.float32) * scale
    w3 = jax.random.normal(k3, (C, C, K), dtype=jnp.float32) * scale
    # BatchNorm affine params at default init (weight=1, bias=0).
    g1 = g2 = g3 = jnp.ones((C,), jnp.float32)
    b1 = b2 = b3 = jnp.zeros((C,), jnp.float32)

    out = resnet_block_forward(x, w1, w2, w3, g1, b1, g2, b2, g3, b3)
    jax.block_until_ready(out)

    ref = _reference(x, w1, w2, w3, g1, b1, g2, b2, g3, b3)
    assert out.shape == (N, C, L)
    assert jnp.allclose(out, ref, atol=1e-4, rtol=1e-4), "Pallas kernel mismatch vs reference"

    print("KERNEL_OK")
</pallas_src>

<mosaic_0001>
module attributes {stable_mosaic.version = 11 : i64} {
  func.func @_conv_stats_kernel(%arg0: i32, %arg1: memref<1x4x128xf32, #tpu.memory_space<vmem>>, %arg2: memref<3x4x4xf32, #tpu.memory_space<vmem>>, %arg3: memref<1x4x128xf32, #tpu.memory_space<vmem>>, %arg4: memref<1x4x1xf32, #tpu.memory_space<vmem>>, %arg5: memref<1x4x1xf32, #tpu.memory_space<vmem>>) attributes {dimension_semantics = [#tpu.dimension_semantics<parallel>], iteration_bounds = array<i64: 2>, scalar_prefetch = 0 : i64, scratch_operands = 0 : i64, tpu.core_type = #tpu.core_type<tc>, window_params = [{transform_indices = @transform_0, window_bounds = array<i64: 1, 4, 128>}, {pipeline_mode = #tpu.pipeline_mode<synchronous>, transform_indices = @transform_1, window_bounds = array<i64: 3, 4, 4>}, {transform_indices = @transform_2, window_bounds = array<i64: 1, 4, 128>}, {transform_indices = @transform_3, window_bounds = array<i64: 1, 4, 1>}, {transform_indices = @transform_4, window_bounds = array<i64: 1, 4, 1>}]} {
    %c0 = arith.constant 0 : index
    %c0_0 = arith.constant 0 : index
    %c0_1 = arith.constant 0 : index
    %0 = vector.load %arg1[%c0, %c0_0, %c0_1] : memref<1x4x128xf32, #tpu.memory_space<vmem>>, vector<1x4x128xf32>
    %1 = vector.shape_cast %0 : vector<1x4x128xf32> to vector<4x128xf32>
    %c0_2 = arith.constant 0 : index
    %c0_3 = arith.constant 0 : index
    %c0_4 = arith.constant 0 : index
    %2 = vector.load %arg2[%c0_2, %c0_3, %c0_4] : memref<3x4x4xf32, #tpu.memory_space<vmem>>, vector<1x4x4xf32>
    %3 = vector.shape_cast %2 : vector<1x4x4xf32> to vector<4x4xf32>
    %cst = arith.constant dense<0.000000e+00> : vector<4x128xf32>
    %4 = tpu.matmul %3, %1, %cst {dimension_numbers = #tpu.dot_dimension_numbers<[1], [0], [0], [1], [0, 0, 1, 1], [], []>} : vector<4x4xf32>, vector<4x128xf32>, vector<4x128xf32> -> vector<4x128xf32>
    %c1 = arith.constant 1 : index
    %c0_5 = arith.constant 0 : index
    %c0_6 = arith.constant 0 : index
    %5 = vector.load %arg2[%c1, %c0_5, %c0_6] : memref<3x4x4xf32, #tpu.memory_space<vmem>>, vector<1x4x4xf32>
    %6 = vector.shape_cast %5 : vector<1x4x4xf32> to vector<4x4xf32>
    %cst_7 = arith.constant dense<0.000000e+00> : vector<4x128xf32>
    %7 = tpu.matmul %6, %1, %cst_7 {dimension_numbers = #tpu.dot_dimension_numbers<[1], [0], [0], [1], [0, 0, 1, 1], [], []>} : vector<4x4xf32>, vector<4x128xf32>, vector<4x128xf32> -> vector<4x128xf32>
    %c2 = arith.constant 2 : index
    %c0_8 = arith.constant 0 : index
    %c0_9 = arith.constant 0 : index
    %8 = vector.load %arg2[%c2, %c0_8, %c0_9] : memref<3x4x4xf32, #tpu.memory_space<vmem>>, vector<1x4x4xf32>
    %9 = vector.shape_cast %8 : vector<1x4x4xf32> to vector<4x4xf32>
    %cst_10 = arith.constant dense<0.000000e+00> : vector<4x128xf32>
    %10 = tpu.matmul %9, %1, %cst_10 {dimension_numbers = #tpu.dot_dimension_numbers<[1], [0], [0], [1], [0, 0, 1, 1], [], []>} : vector<4x4xf32>, vector<4x128xf32>, vector<4x128xf32> -> vector<4x128xf32>
    %11 = tpu.iota {dimensions = array<i32: 1>} : vector<4x128xi32>
    %c0_i32 = arith.constant 0 : i32
    %12 = vector.broadcast %c0_i32 : i32 to vector<4x128xi32>
    %13 = arith.cmpi sgt, %11, %12 : vector<4x128xi32>
    %c1_i32 = arith.constant 1 : i32
    %14 = tpu.dynamic_rotate %4 by %c1_i32 dim 1 : vector<4x128xf32>, i32 -> vector<4x128xf32>
    %cst_11 = arith.constant 0.000000e+00 : f32
    %15 = vector.broadcast %cst_11 : f32 to vector<4x128xf32>
    %16 = arith.select %13, %14, %15 : vector<4x128xi1>, vector<4x128xf32>
    %c127_i32 = arith.constant 127 : i32
    %17 = vector.broadcast %c127_i32 : i32 to vector<4x128xi32>
    %18 = arith.cmpi slt, %11, %17 : vector<4x128xi32>
    %c127_i32_12 = arith.constant 127 : i32
    %19 = tpu.dynamic_rotate %10 by %c127_i32_12 dim 1 : vector<4x128xf32>, i32 -> vector<4x128xf32>
    %cst_13 = arith.constant 0.000000e+00 : f32
    %20 = vector.broadcast %cst_13 : f32 to vector<4x128xf32>
    %21 = arith.select %18, %19, %20 : vector<4x128xi1>, vector<4x128xf32>
    %22 = arith.addf %16, %7 : vector<4x128xf32>
    %23 = arith.addf %22, %21 : vector<4x128xf32>
    %c0_14 = arith.constant 0 : index
    %c0_15 = arith.constant 0 : index
    %c0_16 = arith.constant 0 : index
    %24 = vector.load %arg3[%c0_14, %c0_15, %c0_16] : memref<1x4x128xf32, #tpu.memory_space<vmem>>, vector<1x4x128xf32>
    %25 = vector.shape_cast %24 : vector<1x4x128xf32> to vector<4x128xf32>
    %26 = vector.shape_cast %23 : vector<4x128xf32> to vector<1x4x128xf32>
    tpu.vector_store %arg3[%c0_14, %c0_15, %c0_16], %26 {strides = array<i32>} : memref<1x4x128xf32, #tpu.memory_space<vmem>>, vector<1x4x128xf32>,
    %cst_17 = arith.constant dense<0.000000e+00> : vector<4xf32>
    %27 = vector.multi_reduction <add>, %23, %cst_17 [1] : vector<4x128xf32> to vector<4xf32>
    %28 = vector.shape_cast %27 : vector<4xf32> to vector<4x1xf32>
    %c0_18 = arith.constant 0 : index
    %c0_19 = arith.constant 0 : index
    %c0_20 = arith.constant 0 : index
    %29 = vector.load %arg4[%c0_18, %c0_19, %c0_20] : memref<1x4x1xf32, #tpu.memory_space<vmem>>, vector<1x4x1xf32>
    %30 = vector.shape_cast %29 : vector<1x4x1xf32> to vector<4x1xf32>
    %31 = vector.shape_cast %28 : vector<4x1xf32> to vector<1x4x1xf32>
    tpu.vector_store %arg4[%c0_18, %c0_19, %c0_20], %31 {strides = array<i32>} : memref<1x4x1xf32, #tpu.memory_space<vmem>>, vector<1x4x1xf32>,
    %32 = arith.mulf %23, %23 : vector<4x128xf32>
    %cst_21 = arith.constant dense<0.000000e+00> : vector<4xf32>
    %33 = vector.multi_reduction <add>, %32, %cst_21 [1] : vector<4x128xf32> to vector<4xf32>
    %34 = vector.shape_cast %33 : vector<4xf32> to vector<4x1xf32>
    %c0_22 = arith.constant 0 : index
    %c0_23 = arith.constant 0 : index
    %c0_24 = arith.constant 0 : index
    %35 = vector.load %arg5[%c0_22, %c0_23, %c0_24] : memref<1x4x1xf32, #tpu.memory_space<vmem>>, vector<1x4x1xf32>
    %36 = vector.shape_cast %35 : vector<1x4x1xf32> to vector<4x1xf32>
    %37 = vector.shape_cast %34 : vector<4x1xf32> to vector<1x4x1xf32>
    tpu.vector_store %arg5[%c0_22, %c0_23, %c0_24], %37 {strides = array<i32>} : memref<1x4x1xf32, #tpu.memory_space<vmem>>, vector<1x4x1xf32>,
    return
  }
  func.func @transform_0(%arg0: i32) -> (i32, i32, i32) {
    %c0_i32 = arith.constant 0 : i32
    %c0_i32_0 = arith.constant 0 : i32
    %c0_i32_1 = arith.constant 0 : i32
    return %arg0, %c0_i32, %c0_i32_0 : i32, i32, i32
  }
  func.func @transform_1(%arg0: i32) -> (i32, i32, i32) {
    %c0_i32 = arith.constant 0 : i32
    %c0_i32_0 = arith.constant 0 : i32
    %c0_i32_1 = arith.constant 0 : i32
    %c0_i32_2 = arith.constant 0 : i32
    return %c0_i32, %c0_i32_0, %c0_i32_1 : i32, i32, i32
  }
  func.func @transform_2(%arg0: i32) -> (i32, i32, i32) {
    %c0_i32 = arith.constant 0 : i32
    %c0_i32_0 = arith.constant 0 : i32
    %c0_i32_1 = arith.constant 0 : i32
    return %arg0, %c0_i32, %c0_i32_0 : i32, i32, i32
  }
  func.func @transform_3(%arg0: i32) -> (i32, i32, i32) {
    %c0_i32 = arith.constant 0 : i32
    %c0_i32_0 = arith.constant 0 : i32
    %c0_i32_1 = arith.constant 0 : i32
    return %arg0, %c0_i32, %c0_i32_0 : i32, i32, i32
  }
  func.func @transform_4(%arg0: i32) -> (i32, i32, i32) {
    %c0_i32 = arith.constant 0 : i32
    %c0_i32_0 = arith.constant 0 : i32
    %c0_i32_1 = arith.constant 0 : i32
    return %arg0, %c0_i32, %c0_i32_0 : i32, i32, i32
  }
}

module attributes {stable_mosaic.version = 11 : i64} {
  func.func @_bn_residual_act_kernel(%arg0: i32, %arg1: memref<1x4x128xf32, #tpu.memory_space<vmem>>, %arg2: memref<4x1xf32, #tpu.memory_space<vmem>>, %arg3: memref<4x1xf32, #tpu.memory_space<vmem>>, %arg4: memref<1x4x128xf32, #tpu.memory_space<vmem>>, %arg5: memref<1x4x128xf32, #tpu.memory_space<vmem>>) attributes {dimension_semantics = [#tpu.dimension_semantics<parallel>], iteration_bounds = array<i64: 2>, scalar_prefetch = 0 : i64, scratch_operands = 0 : i64, tpu.core_type = #tpu.core_type<tc>, window_params = [{transform_indices = @transform_0, window_bounds = array<i64: 1, 4, 128>}, {pipeline_mode = #tpu.pipeline_mode<synchronous>, transform_indices = @transform_1, window_bounds = array<i64: 4, 1>}, {pipeline_mode = #tpu.pipeline_mode<synchronous>, transform_indices = @transform_2, window_bounds = array<i64: 4, 1>}, {transform_indices = @transform_3, window_bounds = array<i64: 1, 4, 128>}, {transform_indices = @transform_4, window_bounds = array<i64: 1, 4, 128>}]} {
    %c0 = arith.constant 0 : index
    %c0_0 = arith.constant 0 : index
    %c0_1 = arith.constant 0 : index
    %0 = vector.load %arg1[%c0, %c0_0, %c0_1] : memref<1x4x128xf32, #tpu.memory_space<vmem>>, vector<1x4x128xf32>
    %1 = vector.shape_cast %0 : vector<1x4x128xf32> to vector<4x128xf32>
    %c0_2 = arith.constant 0 : index
    %c0_3 = arith.constant 0 : index
    %2 = vector.load %arg2[%c0_2, %c0_3] : memref<4x1xf32, #tpu.memory_space<vmem>>, vector<4x1xf32>
    %3 = vector.broadcast %2 : vector<4x1xf32> to vector<4x128xf32>
    %4 = arith.mulf %1, %3 : vector<4x128xf32>
    %c0_4 = arith.constant 0 : index
    %c0_5 = arith.constant 0 : index
    %5 = vector.load %arg3[%c0_4, %c0_5] : memref<4x1xf32, #tpu.memory_space<vmem>>, vector<4x1xf32>
    %6 = vector.broadcast %5 : vector<4x1xf32> to vector<4x128xf32>
    %7 = arith.addf %4, %6 : vector<4x128xf32>
    %c0_6 = arith.constant 0 : index
    %c0_7 = arith.constant 0 : index
    %c0_8 = arith.constant 0 : index
    %8 = vector.load %arg4[%c0_6, %c0_7, %c0_8] : memref<1x4x128xf32, #tpu.memory_space<vmem>>, vector<1x4x128xf32>
    %9 = vector.shape_cast %8 : vector<1x4x128xf32> to vector<4x128xf32>
    %10 = arith.addf %7, %9 : vector<4x128xf32>
    %cst = arith.constant 0.000000e+00 : f32
    %11 = vector.broadcast %cst : f32 to vector<4x128xf32>
    %12 = arith.maximumf %10, %11 : vector<4x128xf32>
    %c0_9 = arith.constant 0 : index
    %c0_10 = arith.constant 0 : index
    %c0_11 = arith.constant 0 : index
    %13 = vector.load %arg5[%c0_9, %c0_10, %c0_11] : memref<1x4x128xf32, #tpu.memory_space<vmem>>, vector<1x4x128xf32>
    %14 = vector.shape_cast %13 : vector<1x4x128xf32> to vector<4x128xf32>
    %15 = vector.shape_cast %12 : vector<4x128xf32> to vector<1x4x128xf32>
    tpu.vector_store %arg5[%c0_9, %c0_10, %c0_11], %15 {strides = array<i32>} : memref<1x4x128xf32, #tpu.memory_space<vmem>>, vector<1x4x128xf32>,
    return
  }
  func.func @transform_0(%arg0: i32) -> (i32, i32, i32) {
    %c0_i32 = arith.constant 0 : i32
    %c0_i32_0 = arith.constant 0 : i32
    %c0_i32_1 = arith.constant 0 : i32
    return %arg0, %c0_i32, %c0_i32_0 : i32, i32, i32
  }
  func.func @transform_1(%arg0: i32) -> (i32, i32) {
    %c0_i32 = arith.constant 0 : i32
    %c0_i32_0 = arith.constant 0 : i32
    %c0_i32_1 = arith.constant 0 : i32
    return %c0_i32, %c0_i32_0 : i32, i32
  }
  func.func @transform_2(%arg0: i32) -> (i32, i32) {
    %c0_i32 = arith.constant 0 : i32
    %c0_i32_0 = arith.constant 0 : i32
    %c0_i32_1 = arith.constant 0 : i32
    return %c0_i32, %c0_i32_0 : i32, i32
  }
  func.func @transform_3(%arg0: i32) -> (i32, i32, i32) {
    %c0_i32 = arith.constant 0 : i32
    %c0_i32_0 = arith.constant 0 : i32
    %c0_i32_1 = arith.constant 0 : i32
    return %arg0, %c0_i32, %c0_i32_0 : i32, i32, i32
  }
  func.func @transform_4(%arg0: i32) -> (i32, i32, i32) {
    %c0_i32 = arith.constant 0 : i32
    %c0_i32_0 = arith.constant 0 : i32
    %c0_i32_1 = arith.constant 0 : i32
    return %arg0, %c0_i32, %c0_i32_0 : i32, i32, i32
  }
}

module attributes {stable_mosaic.version = 11 : i64} {
  func.func @_bn_act_conv_stats_kernel(%arg0: i32, %arg1: memref<1x4x128xf32, #tpu.memory_space<vmem>>, %arg2: memref<4x1xf32, #tpu.memory_space<vmem>>, %arg3: memref<4x1xf32, #tpu.memory_space<vmem>>, %arg4: memref<3x4x4xf32, #tpu.memory_space<vmem>>, %arg5: memref<1x4x128xf32, #tpu.memory_space<vmem>>, %arg6: memref<1x4x1xf32, #tpu.memory_space<vmem>>, %arg7: memref<1x4x1xf32, #tpu.memory_space<vmem>>) attributes {dimension_semantics = [#tpu.dimension_semantics<parallel>], iteration_bounds = array<i64: 2>, scalar_prefetch = 0 : i64, scratch_operands = 0 : i64, tpu.core_type = #tpu.core_type<tc>, window_params = [{transform_indices = @transform_0, window_bounds = array<i64: 1, 4, 128>}, {pipeline_mode = #tpu.pipeline_mode<synchronous>, transform_indices = @transform_1, window_bounds = array<i64: 4, 1>}, {pipeline_mode = #tpu.pipeline_mode<synchronous>, transform_indices = @transform_2, window_bounds = array<i64: 4, 1>}, {pipeline_mode = #tpu.pipeline_mode<synchronous>, transform_indices = @transform_3, window_bounds = array<i64: 3, 4, 4>}, {transform_indices = @transform_4, window_bounds = array<i64: 1, 4, 128>}, {transform_indices = @transform_5, window_bounds = array<i64: 1, 4, 1>}, {transform_indices = @transform_6, window_bounds = array<i64: 1, 4, 1>}]} {
    %c0 = arith.constant 0 : index
    %c0_0 = arith.constant 0 : index
    %c0_1 = arith.constant 0 : index
    %0 = vector.load %arg1[%c0, %c0_0, %c0_1] : memref<1x4x128xf32, #tpu.memory_space<vmem>>, vector<1x4x128xf32>
    %1 = vector.shape_cast %0 : vector<1x4x128xf32> to vector<4x128xf32>
    %c0_2 = arith.constant 0 : index
    %c0_3 = arith.constant 0 : index
    %2 = vector.load %arg2[%c0_2, %c0_3] : memref<4x1xf32, #tpu.memory_space<vmem>>, vector<4x1xf32>
    %3 = vector.broadcast %2 : vector<4x1xf32> to vector<4x128xf32>
    %4 = arith.mulf %1, %3 : vector<4x128xf32>
    %c0_4 = arith.constant 0 : index
    %c0_5 = arith.constant 0 : index
    %5 = vector.load %arg3[%c0_4, %c0_5] : memref<4x1xf32, #tpu.memory_space<vmem>>, vector<4x1xf32>
    %6 = vector.broadcast %5 : vector<4x1xf32> to vector<4x128xf32>
    %7 = arith.addf %4, %6 : vector<4x128xf32>
    %cst = arith.constant 0.000000e+00 : f32
    %8 = vector.broadcast %cst : f32 to vector<4x128xf32>
    %9 = arith.maximumf %7, %8 : vector<4x128xf32>
    %c0_6 = arith.constant 0 : index
    %c0_7 = arith.constant 0 : index
    %c0_8 = arith.constant 0 : index
    %10 = vector.load %arg4[%c0_6, %c0_7, %c0_8] : memref<3x4x4xf32, #tpu.memory_space<vmem>>, vector<1x4x4xf32>
    %11 = vector.shape_cast %10 : vector<1x4x4xf32> to vector<4x4xf32>
    %cst_9 = arith.constant dense<0.000000e+00> : vector<4x128xf32>
    %12 = tpu.matmul %11, %9, %cst_9 {dimension_numbers = #tpu.dot_dimension_numbers<[1], [0], [0], [1], [0, 0, 1, 1], [], []>} : vector<4x4xf32>, vector<4x128xf32>, vector<4x128xf32> -> vector<4x128xf32>
    %c1 = arith.constant 1 : index
    %c0_10 = arith.constant 0 : index
    %c0_11 = arith.constant 0 : index
    %13 = vector.load %arg4[%c1, %c0_10, %c0_11] : memref<3x4x4xf32, #tpu.memory_space<vmem>>, vector<1x4x4xf32>
    %14 = vector.shape_cast %13 : vector<1x4x4xf32> to vector<4x4xf32>
    %cst_12 = arith.constant dense<0.000000e+00> : vector<4x128xf32>
    %15 = tpu.matmul %14, %9, %cst_12 {dimension_numbers = #tpu.dot_dimension_numbers<[1], [0], [0], [1], [0, 0, 1, 1], [], []>} : vector<4x4xf32>, vector<4x128xf32>, vector<4x128xf32> -> vector<4x128xf32>
    %c2 = arith.constant 2 : index
    %c0_13 = arith.constant 0 : index
    %c0_14 = arith.constant 0 : index
    %16 = vector.load %arg4[%c2, %c0_13, %c0_14] : memref<3x4x4xf32, #tpu.memory_space<vmem>>, vector<1x4x4xf32>
    %17 = vector.shape_cast %16 : vector<1x4x4xf32> to vector<4x4xf32>
    %cst_15 = arith.constant dense<0.000000e+00> : vector<4x128xf32>
    %18 = tpu.matmul %17, %9, %cst_15 {dimension_numbers = #tpu.dot_dimension_numbers<[1], [0], [0], [1], [0, 0, 1, 1], [], []>} : vector<4x4xf32>, vector<4x128xf32>, vector<4x128xf32> -> vector<4x128xf32>
    %19 = tpu.iota {dimensions = array<i32: 1>} : vector<4x128xi32>
    %c0_i32 = arith.constant 0 : i32
    %20 = vector.broadcast %c0_i32 : i32 to vector<4x128xi32>
    %21 = arith.cmpi sgt, %19, %20 : vector<4x128xi32>
    %c1_i32 = arith.constant 1 : i32
    %22 = tpu.dynamic_rotate %12 by %c1_i32 dim 1 : vector<4x128xf32>, i32 -> vector<4x128xf32>
    %cst_16 = arith.constant 0.000000e+00 : f32
    %23 = vector.broadcast %cst_16 : f32 to vector<4x128xf32>
    %24 = arith.select %21, %22, %23 : vector<4x128xi1>, vector<4x128xf32>
    %c127_i32 = arith.constant 127 : i32
    %25 = vector.broadcast %c127_i32 : i32 to vector<4x128xi32>
    %26 = arith.cmpi slt, %19, %25 : vector<4x128xi32>
    %c127_i32_17 = arith.constant 127 : i32
    %27 = tpu.dynamic_rotate %18 by %c127_i32_17 dim 1 : vector<4x128xf32>, i32 -> vector<4x128xf32>
    %cst_18 = arith.constant 0.000000e+00 : f32
    %28 = vector.broadcast %cst_18 : f32 to vector<4x128xf32>
    %29 = arith.select %26, %27, %28 : vector<4x128xi1>, vector<4x128xf32>
    %30 = arith.addf %24, %15 : vector<4x128xf32>
    %31 = arith.addf %30, %29 : vector<4x128xf32>
    %c0_19 = arith.constant 0 : index
    %c0_20 = arith.constant 0 : index
    %c0_21 = arith.constant 0 : index
    %32 = vector.load %arg5[%c0_19, %c0_20, %c0_21] : memref<1x4x128xf32, #tpu.memory_space<vmem>>, vector<1x4x128xf32>
    %33 = vector.shape_cast %32 : vector<1x4x128xf32> to vector<4x128xf32>
    %34 = vector.shape_cast %31 : vector<4x128xf32> to vector<1x4x128xf32>
    tpu.vector_store %arg5[%c0_19, %c0_20, %c0_21], %34 {strides = array<i32>} : memref<1x4x128xf32, #tpu.memory_space<vmem>>, vector<1x4x128xf32>,
    %cst_22 = arith.constant dense<0.000000e+00> : vector<4xf32>
    %35 = vector.multi_reduction <add>, %31, %cst_22 [1] : vector<4x128xf32> to vector<4xf32>
    %36 = vector.shape_cast %35 : vector<4xf32> to vector<4x1xf32>
    %c0_23 = arith.constant 0 : index
    %c0_24 = arith.constant 0 : index
    %c0_25 = arith.constant 0 : index
    %37 = vector.load %arg6[%c0_23, %c0_24, %c0_25] : memref<1x4x1xf32, #tpu.memory_space<vmem>>, vector<1x4x1xf32>
    %38 = vector.shape_cast %37 : vector<1x4x1xf32> to vector<4x1xf32>
    %39 = vector.shape_cast %36 : vector<4x1xf32> to vector<1x4x1xf32>
    tpu.vector_store %arg6[%c0_23, %c0_24, %c0_25], %39 {strides = array<i32>} : memref<1x4x1xf32, #tpu.memory_space<vmem>>, vector<1x4x1xf32>,
    %40 = arith.mulf %31, %31 : vector<4x128xf32>
    %cst_26 = arith.constant dense<0.000000e+00> : vector<4xf32>
    %41 = vector.multi_reduction <add>, %40, %cst_26 [1] : vector<4x128xf32> to vector<4xf32>
    %42 = vector.shape_cast %41 : vector<4xf32> to vector<4x1xf32>
    %c0_27 = arith.constant 0 : index
    %c0_28 = arith.constant 0 : index
    %c0_29 = arith.constant 0 : index
    %43 = vector.load %arg7[%c0_27, %c0_28, %c0_29] : memref<1x4x1xf32, #tpu.memory_space<vmem>>, vector<1x4x1xf32>
    %44 = vector.shape_cast %43 : vector<1x4x1xf32> to vector<4x1xf32>
    %45 = vector.shape_cast %42 : vector<4x1xf32> to vector<1x4x1xf32>
    tpu.vector_store %arg7[%c0_27, %c0_28, %c0_29], %45 {strides = array<i32>} : memref<1x4x1xf32, #tpu.memory_space<vmem>>, vector<1x4x1xf32>,
    return
  }
  func.func @transform_0(%arg0: i32) -> (i32, i32, i32) {
    %c0_i32 = arith.constant 0 : i32
    %c0_i32_0 = arith.constant 0 : i32
    %c0_i32_1 = arith.constant 0 : i32
    return %arg0, %c0_i32, %c0_i32_0 : i32, i32, i32
  }
  func.func @transform_1(%arg0: i32) -> (i32, i32) {
    %c0_i32 = arith.constant 0 : i32
    %c0_i32_0 = arith.constant 0 : i32
    %c0_i32_1 = arith.constant 0 : i32
    return %c0_i32, %c0_i32_0 : i32, i32
  }
  func.func @transform_2(%arg0: i32) -> (i32, i32) {
    %c0_i32 = arith.constant 0 : i32
    %c0_i32_0 = arith.constant 0 : i32
    %c0_i32_1 = arith.constant 0 : i32
    return %c0_i32, %c0_i32_0 : i32, i32
  }
  func.func @transform_3(%arg0: i32) -> (i32, i32, i32) {
    %c0_i32 = arith.constant 0 : i32
    %c0_i32_0 = arith.constant 0 : i32
    %c0_i32_1 = arith.constant 0 : i32
    %c0_i32_2 = arith.constant 0 : i32
    return %c0_i32, %c0_i32_0, %c0_i32_1 : i32, i32, i32
  }
  func.func @transform_4(%arg0: i32) -> (i32, i32, i32) {
    %c0_i32 = arith.constant 0 : i32
    %c0_i32_0 = arith.constant 0 : i32
    %c0_i32_1 = arith.constant 0 : i32
    return %arg0, %c0_i32, %c0_i32_0 : i32, i32, i32
  }
  func.func @transform_5(%arg0: i32) -> (i32, i32, i32) {
    %c0_i32 = arith.constant 0 : i32
    %c0_i32_0 = arith.constant 0 : i32
    %c0_i32_1 = arith.constant 0 : i32
    return %arg0, %c0_i32, %c0_i32_0 : i32, i32, i32
  }
  func.func @transform_6(%arg0: i32) -> (i32, i32, i32) {
    %c0_i32 = arith.constant 0 : i32
    %c0_i32_0 = arith.constant 0 : i32
    %c0_i32_1 = arith.constant 0 : i32
    return %arg0, %c0_i32, %c0_i32_0 : i32, i32, i32
  }
}

</mosaic_0001>

<bundles_post_ra>
// kernel: resnet_block_forward.7
= control target key start
LH: loop header
LB: loop body
LE: loop exit
PB: predicated region body
PF: predicated region fallthrough
CT: control target
= control target key end

     0   :  { %9 = vsyncpa [#allocation3], 0  ;;  %s566_s0 = inlined_call_operand.vmem [shape: f32[2,4,128], index: 0, kind: input, shape index: {}]   ;;  %s567_s1 = inlined_call_operand.vmem [shape: f32[4,1], index: 1, kind: input, shape index: {}]   ;;  %s568_s2 = inlined_call_operand.vmem [shape: f32[4,1], index: 2, kind: input, shape index: {}]   ;;  %s569_s3 = inlined_call_operand.vmem [shape: f32[2,4,128], index: 3, kind: input, shape index: {}]   ;;  %s570_s4 = inlined_call_operand.hbm [shape: f32[2,4,128], index: 4, kind: output, shape index: {}]  }
   0x1   :  { %11 = vsyncpa [#allocation3 + $0x1], 0  ;;  %s457_s15 = smov 0   ;;  %s459_s16 = smov 0  }
   0x2   :  { %s461_s17 = smov 0   ;;  %s463_s18 = smov 0  }
   0x3 LB: > { %s478_s19 = sadd.s32 4294967295, %s428_s18   ;;  %s314_s20 = sadd.s32 4294967294, %s428_s18   ;;  %s428_s18 = sphi %s463_s18, %s576_s18   ;;  %s424_s17 = sphi %s461_s17, %s575_s17   ;;  %s420_s16 = sphi %s459_s16, %s574_s16   ;;  %s416_s15 = sphi %s457_s15, %s573_s15  }
   0x4   : > { %s482_s21 = sadd.s32 1, %s428_s18   ;;  %s118_s22 = sadd.s32 1, %s424_s17 }
   0x5   : > { %s115_s23 = ssub.s32 %s428_s18, %s482_s21  ;;  %p128_p0 = scmp.ne.s32.totalorder %s424_s17, %s420_s16 }
   0x6   : > { %p116_p1 = scmp.eq.s32.totalorder %s115_s23, 0  ;;  %p129_p2 = scmp.eq.s32.totalorder %s478_s19, 1 }
   0x7   : > { %p134_p3 = scmp.ne.s32.totalorder %s420_s16, %s416_s15  ;;  %p135_p4 = scmp.eq.s32.totalorder %s314_s20, 1 }
   0x8   : > { %s493_s24 = scalar_select %p116_p1, %s424_s17, %s118_s22  }
   0x9   : > { %p495_p5 = por %p129_p2, %p128_p0  ;;  %p499_p6 = por %p135_p4, %p134_p3 }
   0xa   : > { %p317_p7 = scmp.ge.s32.totalorder %s428_s18, 1  ;;  %p173_p8 = scmp.lt.s32.totalorder %s428_s18, 3 }
   0xc   : > { %p174_p9 = pnand %p317_p7, %p173_p8 }
   0xd   : > { %v211_v0 = vld [vmem:[%s567_s1] sm:$0xf] (!%p174_p9)  ;;  %v430_v1 = vmov (!%p174_p9), 0   ;;  %p202_p10 = scmp.lt.s32.totalorder (!%p174_p9), %s478_s19, 1  ;;  %s199_s10 = sand.u32 (!%p174_p9), 1, %s420_s16  }
   0xe   : > { %177 = sbr.rel (%p174_p9) target bundleno = 167 (0xa7), region = 36  ;;  %365 = vset.pattern.permute.xlu0 (!%p174_p9), %v430_v1  ;;  %v218_v2 = vld [vmem:[%s568_s2] sm:$0xf] (!%p174_p9)  ;;  %s318_s11 = sshll.u32 (!%p174_p9), %s199_s10, 2 }
   0xf   : > { %214 = vperm.xlu0 (!%p174_p9), %365, %v211_v0   ;;  %s322_s20 = sshll.u32 (!%p174_p9), %s478_s19, 6  ;;  %s201_s22 = scalar_lea.vmem (!%p174_p9), [#allocation2], %s318_s11 }
  0x10   : > { %s243_s23 = sshll.u32 (!%p174_p9), %s201_s22, 4  ;;  %s524_s29 = scalar_lea.hbm (!%p174_p9), %s570_s4, %s322_s20  ;;  %s526_s23 = int_to_ptr.vmem [resolvable:$true] %s243_s23 }
  0x11   : > { %s230_s30 = scalar_lea.sflag (!%p174_p9), [#allocation3], %s199_s10 }
  0x13   : > { %221 = vperm.xlu0 (!%p174_p9), %365, %v218_v2  }
  0x15   : > { %s203_s5 = scalar_select %p202_p10, %s478_s19, 1 }
  0x16   : > { %s431_s19 = smov [#allocation2]  }
  0x17   : > { %s319_s6 = sshll.u32 %s203_s5, 2  ;;  %s366_s5 = scalar_lea.vmem %s526_s23, 64 }
  0x18   : > { %s205_s9 = scalar_lea.vmem %s566_s0, %s319_s6  ;;  %s209_s14 = scalar_lea.vmem %s569_s3, %s319_s6 }
  0x19   : > { %v210_v4 = vld [vmem:[%s205_s9] sm:$0xf]  ;;  %p367_p11 = scmp.ne.s32.totalorder %s526_s23, %s366_s5  ;;  %s370_s6 = sshll.u32 %s431_s19, 4  ;;  %s371_s6 = int_to_ptr.vmem [resolvable:$false] %s370_s6 }
  0x1a   : > { %v225_v7 = vld [vmem:[%s209_s14] sm:$0xf]  ;;  %s372_s7 = scalar_lea.vmem %s371_s6, 128  ;;  %p373_p0 = scmp.lt.s32.totalorder %s526_s23, %s371_s6 }
  0x1b   : > { %p368_p12 = pnand %p367_p11, %p495_p5  ;;  %p374_p1 = scmp.lt.s32.totalorder %s372_s7, %s366_s5 }
  0x1d   : > { %p369_p13 = pneg %p368_p12  ;;  %p375_p2 = por %p374_p1, %p373_p0 }
  0x1f   : > { %p376_p3 = pnand %p375_p2, %p369_p13 }
  0x8e   : > { %v215_v3 = vpop.permute.xlu0 %214 }
  0x8f   : > { %v217_v5 = vmul.f32 %v215_v3, %v210_v4 }
  0x92   : > { %v222_v6 = vpop.permute.xlu0 %221 }
  0x93   : > { %v224_v8 = vadd.f32 %v222_v6, %v217_v5 }
  0x95   : > { %v226_v9 = vadd.f32 %v225_v7, %v224_v8 }
  0x97   : > { %v227_v10 = vmax.f32 %v226_v9, 0.0 }
  0x99   : > { %228 = vst [vmem:[%s201_s22] sm:$0xf] %v227_v10 }
  0x9a   : > { %379 = shalt.err (!%p376_p3)
}
  0x9b   : > { %s380_s8 = scalar_lea.hbm %s524_s29, 64  ;;  %s384_s11 = scalar_lea.hbm %s570_s4, 128 }
  0x9c   : > { %p381_p4 = scmp.ne.s32.totalorder %s524_s29, %s380_s8  ;;  %p385_p9 = scmp.lt.u32.totalorder %s524_s29, %s570_s4 }
  0x9d   : > { %p386_p10 = scmp.lt.u32.totalorder %s384_s11, %s380_s8  ;;  %p388_p12 = scmp.lt.u32.totalorder %s380_s8, %s524_s29 }
  0x9e   : > { %p382_p7 = pnand %p381_p4, %p495_p5 }
  0x9f   : > { %p387_p11 = por %p386_p10, %p385_p9 }
  0xa0   : > { %p383_p8 = pneg %p382_p7 }
  0xa1   : > { %p389_p13 = por %p388_p12, %p387_p11 }
  0xa3   : > { %p390_p0 = pnand %p389_p13, %p383_p8 }
  0xa5   : > { %393 = shalt.err (!%p390_p0)
}
  0xa6   : > { %325 = dma.vmem_to_hbm [thread:$0]  (%p495_p5), %s526_s23, 64, %s524_s29, %s230_s30  }
  0xa7 PF: > { %p331_p1 = scmp.ge.s32.totalorder %s428_s18, 2  ;;  %s255_s14 = sand.u32 1, %s416_s15  }
  0xa8   : > { %s256_s20 = scalar_lea.sflag [#allocation3], %s255_s14 }
  0xa9   : > { %p328_p2 = pnand %p331_p1, %p499_p6 }
  0xab   : > { %411 = dma.done.wait (!%p328_p2), %s256_s20, 64  }
  0xac   : > { %413 = vsyncadd (!%p328_p2), %s256_s20, 4294967232  ;;  %p14_p3 = scmp.ge.s32.totalorder %s482_s21, 4   ;;  %s573_s15 = smov %s420_s16 }
  0xad   : > { %s574_s16 = smov %s424_s17  ;;  %s575_s17 = smov %s493_s24 }
  0xae   : > { %s576_s18 = smov %s482_s21  ;;  %16 = sbr.rel (!%p14_p3) target bundleno = 3 (0x3), region = 74 }
  0xb5   :  { %261 = vsyncpa [#allocation3], 1 }
  0xb6   :  { %263 = vsyncpa [#allocation3 + $0x1], 1 }

// kernel: resnet_block_forward.4
= control target key start
LH: loop header
LB: loop body
LE: loop exit
PB: predicated region body
PF: predicated region fallthrough
CT: control target
= control target key end

     0   :  { %10 = vsyncpa [#allocation3], 0  ;;  %s746_s15 = smov 0   ;;  %s822_s0 = inlined_call_operand.vmem [shape: f32[2,4,128], index: 0, kind: input, shape index: {}]   ;;  %s823_s1 = inlined_call_operand.hbm [shape: f32[3,4,4], index: 1, kind: input, shape index: {}]   ;;  %s824_s2 = inlined_call_operand.vmem [shape: f32[2,4,128], index: 2, kind: output, shape index: {0}]   ;;  %s825_s3 = inlined_call_operand.vmem [shape: f32[2,4,1], index: 3, kind: output, shape index: {1}]   ;;  %s826_s4 = inlined_call_operand.vmem [shape: f32[2,4,1], index: 4, kind: output, shape index: {2}]  }
   0x1 LB: > { %s752_s16 = sadd.s32 4294967295, %s712_s15   ;;  %p611_p0 = scmp.ge.s32.totalorder %s712_s15, 1  ;;  %s712_s15 = sphi %s746_s15, %s16_s15  }
   0x2   : > { %p146_p1 = scmp.lt.s32.totalorder %s712_s15, 3  ;;  %s714_s17 = smov [#allocation2]  }
   0x3   : > { %s158_s18 = sshll.u32 %s714_s17, 4  ;;  %p827_p3 = scmp.eq.s32.totalorder %s752_s16, 0  ;;  %s159_s18 = int_to_ptr.vmem [resolvable:$true] %s158_s18 }
   0x4   : > { %p756_p2 = pnand %p611_p0, %p146_p1  ;;  %s674_s23 = scalar_lea.hbm %s823_s1, 192 }
   0x5   : > { %p675_p6 = scmp.ne.s32.totalorder %s823_s1, %s674_s23  ;;  %p681_p10 = scmp.lt.u32.totalorder %s674_s23, %s823_s1 }
   0x6   : > { %s829_s19 = scalar_select %p756_p2, 1, 0 }
   0x7   : > { %p653_p4 = pneg %p756_p2 }
   0x9   : > { %p765_p5 = pnand %p827_p3, %p653_p4 }
   0xb   : > { %p676_p7 = pneg %p765_p5 }
   0xd   : > { %p677_p8 = pnand %p676_p7, %p675_p6 }
   0xf   : > { %p678_p9 = pneg %p677_p8 }
  0x11   : > { %p683_p11 = pnand %p681_p10, %p678_p9 }
  0x13   : > { %686 = shalt.err (!%p683_p11)
}
  0x14   : > { %s687_s28 = scalar_lea.vmem %s159_s18, 192  ;;  %p695_p1 = scmp.lt.s32.totalorder %s159_s18, %s159_s18 }
  0x15   : > { %p688_p12 = scmp.ne.s32.totalorder %s159_s18, %s687_s28  ;;  %p696_p4 = scmp.lt.s32.totalorder %s687_s28, %s687_s28 }
  0x17   : > { %p690_p13 = pnand %p688_p12, %p676_p7  ;;  %p697_p3 = por %p696_p4, %p695_p1 }
  0x19   : > { %p691_p0 = pneg %p690_p13 }
  0x1b   : > { %p698_p2 = pnand %p697_p3, %p691_p0 }
  0x1d   : > { %701 = shalt.err (!%p698_p2)
}
  0x1e   : > { %s715_s29 = smov 64   ;;  %s716_s30 = smov 4  }
  0x1f   : > { %656 = dma.hbm_to_vmem [thread:$0]  (!%p765_p5), %s823_s1, 192, %s159_s18, [#allocation3], %s715_s29, %s715_s29, %s716_s30  }
  0x20   : > { %p831_p6 = scmp.ne.s32.totalorder %s829_s19, 0 }
  0x21   : > { %p832_p8 = scmp.eq.s32.totalorder (!%p831_p6), %s752_s16, 0 }
  0x22   : > { %181 = sbr.rel (%p831_p6) target bundleno = 531 (0x213), region = 28 }
  0x29   : > { %707 = dma.done.wait (%p832_p8), [#allocation3], 192   ;;  %p833_p7 = pmov %p832_p8 }
  0x2a   : > { %p213_p2 = scmp.lt.s32.totalorder %s752_s16, 1  ;;  %v717_v0 = vmov 0.0   ;;  %vm718_vm0 = vmmov 0   ;;  %vm235_vm1 = vcmask 1043456   ;;  %vm231_vm2 = vcmask 31744   ;;  %s719_s11 = smov 1  }
  0x2b   : > { %709 = vsyncadd (%p833_p7), [#allocation3], 4294967104  ;;  %634 = vmatprep.subr.mxu0 %v717_v0  ;;  %636 = vmatprep.mubr.msk.f32.mxu0 %vm718_vm0, %v717_v0  ;;  %v230_v2 = vld [vmem:[#allocation2] sm:$0xf]  ;;  %v310_v3 = vld [vmem:[#allocation2 + $0x4] sm:$0xf]  ;;  %v459_v11 = vlaneseq }
  0x2c   : > { %s835_s16 = smov (!%p213_p2, %s752_s16), 1  ;;  %639 = vmatprep.subr.mxu1 %v717_v0  ;;  %641 = vmatprep.mubr.msk.f32.mxu1 %vm718_vm0, %v717_v0  ;;  %v385_v4 = vld [vmem:[#allocation2 + $0x8] sm:$0xf]  ;;  %s720_s12 = smov 127   ;;  %vm475_vm5 = vcmask 3072  }
  0x2d   : > { %s795_s7 = sshll.u32 %s835_s16, 2  ;;  %v460_v12 = vand.u32 127, %v459_v11 }
  0x2e   : > { %s216_s10 = scalar_lea.vmem %s822_s0, %s795_s7  ;;  %s220_s16 = scalar_lea.vmem %s824_s2, %s795_s7 }
  0x2f   : > { %v229_v1 = vld [vmem:[%s216_s10] sm:$0xf]  ;;  %vm461_vm3 = vcmp.gt.s32.totalorder %v460_v12, 0  ;;  %vm465_vm4 = vcmp.lt.s32.totalorder %v460_v12, 127  ;;  %s224_s19 = scalar_lea.vmem %s825_s3, %s795_s7  ;;  %s228_s22 = scalar_lea.vmem %s826_s4, %s795_s7 }
  0x30   : > { %635 = vmatpush3.msk.msra.mxu0 %vm235_vm1, %v229_v1  ;;  %640 = vmatpush3.msk.msra.mxu1 %vm235_vm1, %v229_v1 }
  0x31   : > { %637 = vmatmul.mubr.msk.f32.vlgmr.msra.gmra.mrb[0].mxu0 %vm231_vm2, %v230_v2  ;;  %644 = vmatprep.subr.mxu0 %v717_v0 }
  0x32   : > { %645 = vmatpush3.msk.msra.mxu0 %vm235_vm1, %v229_v1  ;;  %646 = vmatprep.mubr.msk.f32.mxu0 %vm718_vm0, %v717_v0 }
  0x33   : > { %642 = vmatmul.mubr.msk.f32.vlgmr.msra.gmra.mrb[0].mxu1 %vm231_vm2, %v310_v3 }
  0x35   : > { %647 = vmatmul.mubr.msk.f32.vlgmr.msra.gmra.mrb[2].mxu0 %vm231_vm2, %v385_v4 }
 0x104   : > { %v305_v5 = vpop.f32.mrb[0].mxu0 }
 0x105   : > { %462 = vrot.lane.b32.xlu0 %v305_v5, %s719_s11  ;;  %v638_v6 = vpop.f32.mrb[1].mxu0 }
 0x106   : > { %v380_v7 = vpop.f32.mrb[0].mxu1 }
 0x107   : > { %v643_v8 = vpop.f32.mrb[1].mxu1 }
 0x108   : > { %v455_v9 = vpop.f32.mrb[2].mxu0 }
 0x109   : > { %466 = vrot.lane.b32.xlu0 %v455_v9, %s720_s12  ;;  %v648_v10 = vpop.f32.mrb[3].mxu0 }
 0x177   : > { %v463_v13 = vpop.permute.xlu0 %462 }
 0x178   : > { %v464_v14 = vsel %vm461_vm3, %v463_v13, 0.0 }
 0x179   : > { %v469_v15 = vadd.f32 %v464_v14, %v380_v7 }
 0x17b   : > { %v467_v16 = vpop.permute.xlu0 %466 }
 0x17c   : > { %v468_v17 = vsel %vm465_vm4, %v467_v16, 0.0 }
 0x17d   : > { %v470_v18 = vadd.f32 %v469_v15, %v468_v17 }
 0x17f   : > { %471 = vst [vmem:[%s220_s16] sm:$0xf] %v470_v18  ;;  %v472_v19 = vsel %vm235_vm1, %v470_v18, 0.0  ;;  %v477_v20 = vmul.f32 %v470_v18, %v470_v18 }
 0x180   : > { %473 = vadd.xlane.f32.xlu1 %v472_v19 }
 0x181   : > { %v478_v21 = vsel %vm235_vm1, %v477_v20, 0.0 }
 0x184   : > { %479 = vadd.xlane.f32.xlu1 %v478_v21 }
 0x20d   : > { %v474_v22 = vpop.xlane.xlu1 %473 }
 0x20e   : > { %476 = vst.msk [vmem:[%s224_s19] sm:$0xf] %vm475_vm5, %v474_v22 }
 0x211   : > { %v480_v23 = vpop.xlane.xlu1 %479 }
 0x212   : > { %481 = vst.msk [vmem:[%s228_s22] sm:$0xf] %vm475_vm5, %v480_v23 }
 0x213 PF: > { %s16_s15 = sadd.s32 1, %s712_s15  }
 0x214   : > { %p13_p3 = scmp.ge.s32.totalorder %s16_s15, 4  }
 0x216   :  { %15 = sbr.rel (!%p13_p3) target bundleno = 1 (0x1), region = 89 }
 0x21d   :  { %529 = vsyncpa [#allocation3], 1 }
 0x21e   :  { %531 = vsyncpa [#allocation3 + $0x1], 1 }

// kernel: resnet_block_forward.5
= control target key start
LH: loop header
LB: loop body
LE: loop exit
PB: predicated region body
PF: predicated region fallthrough
CT: control target
= control target key end

     0   :  { %s753_s21 = smov 0   ;;  %s805_s0 = inlined_call_operand.vmem [shape: f32[2,4,128], index: 0, kind: input, shape index: {}]   ;;  %s806_s1 = inlined_call_operand.vmem [shape: f32[4,1], index: 1, kind: input, shape index: {}]   ;;  %s807_s2 = inlined_call_operand.vmem [shape: f32[4,1], index: 2, kind: input, shape index: {}]   ;;  %s808_s3 = inlined_call_operand.vmem [shape: f32[3,4,4], index: 3, kind: input, shape index: {}]   ;;  %s809_s4 = inlined_call_operand.vmem [shape: f32[2,4,128], index: 4, kind: output, shape index: {0}]   ;;  %s810_s5 = inlined_call_operand.vmem [shape: f32[2,4,1], index: 5, kind: output, shape index: {1}]   ;;  %s811_s6 = inlined_call_operand.vmem [shape: f32[2,4,1], index: 6, kind: output, shape index: {2}]  }
   0x1 LB: > { %s651_s22 = sadd.s32 4294967295, %s711_s21   ;;  %p655_p0 = scmp.ge.s32.totalorder %s711_s21, 1  ;;  %s711_s21 = sphi %s753_s21, %s17_s21  }
   0x2   : > { %p216_p1 = scmp.lt.s32.totalorder %s711_s21, 3 }
   0x4   : > { %p217_p2 = pnand %p655_p0, %p216_p1 }
   0x5   : > { %v269_v0 = vld [vmem:[%s806_s1] sm:$0xf] (!%p217_p2)  ;;  %v713_v1 = vmov (!%p217_p2), 0   ;;  %v714_v3 = vmov (!%p217_p2), 0.0   ;;  %vm715_vm0 = vmmov (!%p217_p2), 0   ;;  %p252_p3 = scmp.lt.s32.totalorder (!%p217_p2), %s651_s22, 1  ;;  %v513_v19 = vlaneseq (!%p217_p2) }
   0x6   : > { %220 = sbr.rel (%p217_p2) target bundleno = 624 (0x270), region = 36  ;;  %704 = vset.pattern.permute.xlu0 (!%p217_p2), %v713_v1  ;;  %v276_v2 = vld [vmem:[%s807_s2] sm:$0xf] (!%p217_p2)  ;;  %676 = vmatprep.subr.mxu0 (!%p217_p2), %v714_v3  ;;  %vm289_vm1 = vcmask (!%p217_p2), 1043456   ;;  %vm285_vm2 = vcmask (!%p217_p2), 31744   ;;  %s716_s13 = smov (!%p217_p2), 1  }
   0x7   : > { %272 = vperm.xlu0 (!%p217_p2), %704, %v269_v0   ;;  %681 = vmatprep.subr.mxu1 (!%p217_p2), %v714_v3  ;;  %v284_v10 = vld [vmem:[%s808_s3] sm:$0xf] (!%p217_p2)  ;;  %v662_v11 = vld [vmem:[%s808_s3 + $0x4] sm:$0xf] (!%p217_p2)  ;;  %v665_v12 = vld [vmem:[%s808_s3 + $0x8] sm:$0xf] (!%p217_p2) }
   0x8   : > { %678 = vmatprep.mubr.msk.f32.mxu0 (!%p217_p2), %vm715_vm0, %v714_v3  ;;  %683 = vmatprep.mubr.msk.f32.mxu1 (!%p217_p2), %vm715_vm0, %v714_v3  ;;  %s717_s14 = smov (!%p217_p2), 127   ;;  %v514_v20 = vand.u32 (!%p217_p2), 127, %v513_v19  ;;  %vm529_vm5 = vcmask (!%p217_p2), 3072  }
   0xa   : > { %vm515_vm3 = vcmp.gt.s32.totalorder (!%p217_p2), %v514_v20, 0  ;;  %vm519_vm4 = vcmp.lt.s32.totalorder (!%p217_p2), %v514_v20, 127 }
   0xb   : > { %279 = vperm.xlu0 (!%p217_p2), %704, %v276_v2  }
   0xd   : > { %s813_s22 = smov (!%p252_p3, %s651_s22), 1 }
   0xe   : > { %s769_s27 = sshll.u32 %s813_s22, 2 }
   0xf   : > { %s255_s30 = scalar_lea.vmem %s805_s0, %s769_s27  ;;  %s259_s17 = scalar_lea.vmem %s809_s4, %s769_s27 }
  0x10   : > { %v268_v5 = vld [vmem:[%s255_s30] sm:$0xf]  ;;  %s263_s20 = scalar_lea.vmem %s810_s5, %s769_s27  ;;  %s267_s24 = scalar_lea.vmem %s811_s6, %s769_s27 }
  0x86   : > { %v273_v4 = vpop.permute.xlu0 %272 }
  0x87   : > { %v275_v6 = vmul.f32 %v273_v4, %v268_v5 }
  0x8a   : > { %v280_v7 = vpop.permute.xlu0 %279 }
  0x8b   : > { %v282_v8 = vadd.f32 %v280_v7, %v275_v6 }
  0x8d   : > { %v283_v9 = vmax.f32 %v282_v8, 0.0 }
  0x8f   : > { %677 = vmatpush3.msk.msra.mxu0 %vm289_vm1, %v283_v9  ;;  %682 = vmatpush3.msk.msra.mxu1 %vm289_vm1, %v283_v9 }
  0x90   : > { %679 = vmatmul.mubr.msk.f32.vlgmr.msra.gmra.mrb[0].mxu0 %vm285_vm2, %v284_v10  ;;  %686 = vmatprep.subr.mxu0 %v714_v3 }
  0x91   : > { %687 = vmatpush3.msk.msra.mxu0 %vm289_vm1, %v283_v9  ;;  %688 = vmatprep.mubr.msk.f32.mxu0 %vm715_vm0, %v714_v3 }
  0x92   : > { %684 = vmatmul.mubr.msk.f32.vlgmr.msra.gmra.mrb[0].mxu1 %vm285_vm2, %v662_v11 }
  0x94   : > { %689 = vmatmul.mubr.msk.f32.vlgmr.msra.gmra.mrb[2].mxu0 %vm285_vm2, %v665_v12 }
 0x163   : > { %v359_v13 = vpop.f32.mrb[0].mxu0 }
 0x164   : > { %516 = vrot.lane.b32.xlu1 %v359_v13, %s716_s13  ;;  %v680_v14 = vpop.f32.mrb[1].mxu0 }
 0x165   : > { %v434_v15 = vpop.f32.mrb[0].mxu1 }
 0x166   : > { %v685_v16 = vpop.f32.mrb[1].mxu1 }
 0x167   : > { %v509_v17 = vpop.f32.mrb[2].mxu0 }
 0x168   : > { %520 = vrot.lane.b32.xlu1 %v509_v17, %s717_s14  ;;  %v690_v18 = vpop.f32.mrb[3].mxu0 }
 0x1d6   : > { %v517_v21 = vpop.permute.xlu1 %516 }
 0x1d7   : > { %v518_v22 = vsel %vm515_vm3, %v517_v21, 0.0 }
 0x1d8   : > { %v523_v23 = vadd.f32 %v518_v22, %v434_v15 }
 0x1da   : > { %v521_v24 = vpop.permute.xlu1 %520 }
 0x1db   : > { %v522_v25 = vsel %vm519_vm4, %v521_v24, 0.0 }
 0x1dc   : > { %v524_v26 = vadd.f32 %v523_v23, %v522_v25 }
 0x1de   : > { %525 = vst [vmem:[%s259_s17] sm:$0xf] %v524_v26  ;;  %v526_v27 = vsel %vm289_vm1, %v524_v26, 0.0  ;;  %v531_v28 = vmul.f32 %v524_v26, %v524_v26 }
 0x1df   : > { %527 = vadd.xlane.f32.xlu0 %v526_v27 }
 0x1e0   : > { %v532_v29 = vsel %vm289_vm1, %v531_v28, 0.0 }
 0x1e1   : > { %533 = vadd.xlane.f32.xlu1 %v532_v29 }
 0x26c   : > { %v528_v30 = vpop.xlane.xlu0 %527 }
 0x26d   : > { %530 = vst.msk [vmem:[%s263_s20] sm:$0xf] %vm529_vm5, %v528_v30 }
 0x26e   : > { %v534_v31 = vpop.xlane.xlu1 %533 }
 0x26f   : > { %535 = vst.msk [vmem:[%s267_s24] sm:$0xf] %vm529_vm5, %v534_v31 }
 0x270 PF: > { %s17_s21 = sadd.s32 1, %s711_s21  }
 0x271   : > { %p14_p4 = scmp.ge.s32.totalorder %s17_s21, 4  }
 0x273   :  { %16 = sbr.rel (!%p14_p4) target bundleno = 1 (0x1), region = 92 }

</bundles_post_ra>
